<compile_context>
chip_gen: v7x
topology: tpu7x:2x2x1
jax: 0.10.0
libtpu: 0.0.40
codegen_flags: <defaults>
</compile_context>

<pallas_src>
import functools
import jax
import jax.numpy as jnp
from jax.experimental import pallas as pl
from jax.experimental.pallas import tpu as pltpu


# ----------------------------------------------------------------------------
# Pallas kernel: fused segmented Linear + LayerNorm (edge embedding hot path)
#   y   = sum_s x_s @ W_s + b      (bf16 inputs, f32 accumulation on the MXU)
#   out = LayerNorm(y) * gamma + beta   (eps = 1e-5, PyTorch default, f32)
# ----------------------------------------------------------------------------
def _make_edge_linear_ln_kernel(n_seg):
    def kernel(*refs):
        xs = refs[:n_seg]
        ws = refs[n_seg:2 * n_seg]
        b_ref, g_ref, beta_ref, o_ref = refs[2 * n_seg:]
        y = jnp.dot(xs[0][...], ws[0][...], preferred_element_type=jnp.float32)
        for x_ref, w_ref in zip(xs[1:], ws[1:]):
            y = y + jnp.dot(x_ref[...], w_ref[...],
                            preferred_element_type=jnp.float32)
        y = y + b_ref[...]
        mu = jnp.mean(y, axis=-1, keepdims=True)
        d = y - mu
        var = jnp.mean(d * d, axis=-1, keepdims=True)
        yn = d * jax.lax.rsqrt(var + 1e-5)
        o_ref[...] = (yn * g_ref[...] + beta_ref[...]).astype(o_ref.dtype)
    return kernel


def edge_linear_layernorm(x_segments, w_segments, b, gamma, beta,
                          *, block_m=1024):
    """LayerNorm(concat(x_segments) @ concat_rows(w_segments) + b)*gamma + beta.

    The wide concat is never written to HBM: each segment is streamed
    separately (bf16) and multiplied by the matching row-slice of the weight,
    with the partial products summed in-kernel in f32.
    """
    n_seg = len(x_segments)
    M = x_segments[0].shape[0]
    Dout = w_segments[0].shape[1]

    # Large row tile to amortize per-grid-step overhead; clamp so the block
    # never exceeds the array.  The ragged last block (when block_m does not
    # divide M) is fine: LayerNorm is strictly row-wise, so masked/garbage
    # rows in the final partial block never touch valid rows and are not
    # stored.  Do NOT add cross-row reductions to the kernel body.
    bm = min(block_m, M)
    grid = (pl.cdiv(M, bm),)

    xs = [x.astype(jnp.bfloat16) for x in x_segments]
    ws = [w.astype(jnp.bfloat16) for w in w_segments]

    in_specs = (
        [pl.BlockSpec((bm, x.shape[1]), lambda i: (i, 0)) for x in xs]
        + [pl.BlockSpec((w.shape[0], Dout), lambda i: (0, 0)) for w in ws]
        + [pl.BlockSpec((1, Dout), lambda i: (0, 0))] * 3
    )

    # TODO(synk): Dout=32 < 128 lanes -> masked stores; packing 4 logical rows
    # per 128-lane output row is a further (minor) win if the vst slot binds.
    return pl.pallas_call(
        _make_edge_linear_ln_kernel(n_seg),
        out_shape=jax.ShapeDtypeStruct((M, Dout), jnp.float32),
        grid=grid,
        in_specs=in_specs,
        out_specs=pl.BlockSpec((bm, Dout), lambda i: (i, 0)),
        compiler_params=pltpu.CompilerParams(
            dimension_semantics=("parallel",),
            vmem_limit_bytes=32 * 1024 * 1024,  # few-MB actual use; safe on v7x
        ),
    )(*xs, *ws, b.reshape(1, -1), gamma.reshape(1, -1), beta.reshape(1, -1))


def _linear_layernorm_ref(x, w, b, gamma, beta, eps=1e-5):
    """Plain-JAX Linear+LayerNorm (node path + correctness reference)."""
    y = x @ w + b
    mu = jnp.mean(y, -1, keepdims=True)
    d = y - mu
    var = jnp.mean(d * d, -1, keepdims=True)
    return d * jax.lax.rsqrt(var + eps) * gamma + beta


# ----------------------------------------------------------------------------
# Plain-JAX glue reproducing the PyTorch geometric feature extraction
# ----------------------------------------------------------------------------
def _normalize(x, axis=-1, eps=1e-12):
    n = jnp.linalg.norm(x, axis=axis, keepdims=True)
    return x / jnp.maximum(n, eps)


def gather_edges(edges, neighbor_idx):
    # edges [B,L,L,C], neighbor_idx [B,L,K] -> [B,L,K,C]
    return jnp.take_along_axis(edges, neighbor_idx[..., None], axis=2)


def gather_nodes(nodes, neighbor_idx):
    # nodes [B,L,C], neighbor_idx [B,L,K] -> [B,L,K,C]
    B, L, K = neighbor_idx.shape
    C = nodes.shape[-1]
    flat = neighbor_idx.reshape(B, L * K)
    out = jnp.take_along_axis(nodes, flat[..., None], axis=1)
    return out.reshape(B, L, K, C)


def _dist(X, mask, top_k, eps=1e-6):
    mask_2D = mask[:, None, :] * mask[:, :, None]
    dX = X[:, None, :, :] - X[:, :, None, :]
    D = mask_2D * jnp.sqrt(jnp.sum(dX ** 2, axis=3) + eps)
    D_max = jnp.max(D, axis=-1, keepdims=True)
    D_adjust = D + (1.0 - mask_2D) * D_max
    k = min(top_k, X.shape[1])
    # TODO(synk): torch.topk(largest=False) tie-breaking may differ from lax.top_k
    neg_D, E_idx = jax.lax.top_k(-D_adjust, k)
    D_neighbors = -neg_D
    mask_neighbors = gather_edges(mask_2D[..., None], E_idx)
    return D_neighbors, E_idx, mask_neighbors


def _rbf(D, num_rbf=16):
    D_mu = jnp.linspace(2.0, 22.0, num_rbf).reshape((1,) * D.ndim + (-1,))
    D_sigma = (22.0 - 2.0) / num_rbf
    return jnp.exp(-(((D[..., None] - D_mu) / D_sigma) ** 2))


def _get_rbf(A, Bc, E_idx, num_rbf=16):
    D_A_B = jnp.sqrt(jnp.sum((A[:, :, None, :] - Bc[:, None, :, :]) ** 2, -1) + 1e-6)
    D_nb = gather_edges(D_A_B[..., None], E_idx)[..., 0]
    return _rbf(D_nb, num_rbf)


def _quaternions(R):
    diag = jnp.stack([R[..., 0, 0], R[..., 1, 1], R[..., 2, 2]], -1)
    Rxx, Ryy, Rzz = diag[..., 0], diag[..., 1], diag[..., 2]
    magnitudes = 0.5 * jnp.sqrt(jnp.abs(
        1.0 + jnp.stack([Rxx - Ryy - Rzz, -Rxx + Ryy - Rzz, -Rxx - Ryy + Rzz], -1)))
    signs = jnp.sign(jnp.stack([R[..., 2, 1] - R[..., 1, 2],
                                R[..., 0, 2] - R[..., 2, 0],
                                R[..., 1, 0] - R[..., 0, 1]], -1))
    xyz = signs * magnitudes
    w = jnp.sqrt(jax.nn.relu(1.0 + jnp.sum(diag, -1, keepdims=True))) / 2.0
    Q = jnp.concatenate([xyz, w], -1)
    return _normalize(Q, -1)


def _get_orientations(A, Bc, C, E_idx, eps=1e-6):
    v1 = A - Bc
    v2 = C - Bc
    e1 = v1 / (jnp.linalg.norm(v1, axis=-1, keepdims=True) + eps)
    u2 = v2 - jnp.sum(e1 * v2, -1, keepdims=True) * e1
    e2 = u2 / (jnp.linalg.norm(u2, axis=-1, keepdims=True) + eps)
    e3 = jnp.cross(e1, e2)
    O = jnp.stack([e1, e2, e3], axis=-1)              # columns = e1,e2,e3
    B_, L_ = O.shape[0], O.shape[1]
    Oflat = O.reshape(B_, L_, 9)
    O_neighbors = gather_nodes(Oflat, E_idx).reshape(B_, L_, -1, 3, 3)
    B_neighbors = gather_nodes(Bc, E_idx)
    dX = B_neighbors - Bc[:, :, None, :]
    dU = jnp.matmul(O[:, :, None], dX[..., None])[..., 0]
    dU = _normalize(dU, -1)
    R = jnp.matmul(jnp.swapaxes(O[:, :, None], -1, -2), O_neighbors)
    Q = _quaternions(R)
    return jnp.concatenate([dU, Q], -1)               # [B,L,K,7]


def _orientations_coarse(X, E_idx, eps=1e-6):
    dX = X[:, 1:, :] - X[:, :-1, :]
    U = _normalize(dX, -1)
    u_2, u_1, u_0 = U[:, :-2, :], U[:, 1:-1, :], U[:, 2:, :]
    n_2 = _normalize(jnp.cross(u_2, u_1), -1)
    n_1 = _normalize(jnp.cross(u_1, u_0), -1)
    cosA = jnp.clip(-jnp.sum(u_1 * u_0, -1), -1 + eps, 1 - eps)
    A = jnp.arccos(cosA)
    cosD = jnp.clip(jnp.sum(n_2 * n_1, -1), -1 + eps, 1 - eps)
    D = jnp.sign(jnp.sum(u_2 * n_1, -1)) * jnp.arccos(cosD)
    AD_features = jnp.stack([jnp.cos(A), jnp.sin(A) * jnp.cos(D), jnp.sin(A) * jnp.sin(D)], 2)
    AD_features = jnp.pad(AD_features, ((0, 0), (1, 2), (0, 0)))
    o_1 = _normalize(u_2 - u_1, -1)
    O = jnp.stack([o_1, n_2, jnp.cross(o_1, n_2)], axis=2)   # rows = o1,n2,cross
    B_, Lm3 = O.shape[0], O.shape[1]
    O = O.reshape(B_, Lm3, 9)
    O = jnp.pad(O, ((0, 0), (1, 2), (0, 0)))
    L_ = O.shape[1]
    O_neighbors = gather_nodes(O, E_idx).reshape(B_, L_, -1, 3, 3)
    X_neighbors = gather_nodes(X, E_idx)
    Om = O.reshape(B_, L_, 3, 3)
    dX2 = X_neighbors - X[:, :, None, :]
    dU = jnp.matmul(Om[:, :, None], dX2[..., None])[..., 0]
    dU = _normalize(dU, -1)
    R = jnp.matmul(jnp.swapaxes(Om[:, :, None], -1, -2), O_neighbors)
    Q = _quaternions(R)
    O_features = jnp.concatenate([dU, Q], -1)
    return AD_features, O_features


def _dihedrals(X, dihedral_mask, eps=1e-7):
    B, L = X.shape[0], X.shape[1]
    Xb = X[:, :, :3, :].reshape(B, 3 * L, 3)
    dX = Xb[:, 1:, :] - Xb[:, :-1, :]
    U = _normalize(dX, -1)
    u_2, u_1, u_0 = U[:, :-2, :], U[:, 1:-1, :], U[:, 2:, :]
    n_2 = _normalize(jnp.cross(u_2, u_1), -1)
    n_1 = _normalize(jnp.cross(u_1, u_0), -1)
    cosD = jnp.clip(jnp.sum(n_2 * n_1, -1), -1 + eps, 1 - eps)
    D = jnp.sign(jnp.sum(u_2 * n_1, -1)) * jnp.arccos(cosD)
    D = jnp.pad(D, ((0, 0), (1, 2)))
    D = D.reshape(B, L, 3)
    return jnp.concatenate([jnp.cos(D) * dihedral_mask, jnp.sin(D) * dihedral_mask], 2)


# ----------------------------------------------------------------------------
# ProteinFeatures forward (features_type='full', augment_eps=0.0)
# ----------------------------------------------------------------------------
def protein_features_forward(params, X, L_unused, mask, residue_idx,
                             dihedral_mask, chain_labels,
                             *, top_k=30, num_rbf=16, max_rel=32,
                             edge_block_m=1024):
    b = X[:, :, 1, :] - X[:, :, 0, :]
    c = X[:, :, 2, :] - X[:, :, 1, :]
    a = jnp.cross(b, c)
    Cb = -0.58273431 * a + 0.56802827 * b - 0.54067466 * c + X[:, :, 1, :]
    X_ca = X[:, :, 1, :]

    D_neighbors, E_idx, _mask_nb = _dist(X_ca, mask, top_k)
    _AD_features, O_features = _orientations_coarse(X_ca, E_idx)

    N, Ca, C, O = X[:, :, 0, :], X[:, :, 1, :], X[:, :, 2, :], X[:, :, 3, :]

    RBF_all = [_rbf(D_neighbors, num_rbf)]
    for Aat, Bat in [(N, N), (C, C), (O, O), (Cb, Cb),
                     (Ca, N), (Ca, C), (Ca, O), (Ca, Cb),
                     (N, C), (N, O), (N, Cb),
                     (Cb, C), (Cb, O), (O, C)]:
        RBF_all.append(_get_rbf(Aat, Bat, E_idx, num_rbf))
    RBF_all = jnp.concatenate(RBF_all, -1)                       # [B,L,K,240]

    O_feats = [O_features]
    for Aat, Bat, Cat in [(Cb, N, Ca), (Ca, Cb, C), (Cb, Ca, O), (N, Ca, C),
                          (Ca, N, O), (O, C, Ca), (C, Cb, N), (N, O, Cb),
                          (C, O, Cb), (O, C, N)]:
        O_feats.append(_get_orientations(Aat, Bat, Cat, E_idx))
    O_features_all = jnp.concatenate(O_feats, -1)                # [B,L,K,77]

    offset = residue_idx[:, :, None] - residue_idx[:, None, :]
    offset = gather_edges(offset[..., None], E_idx)[..., 0]
    d = jnp.clip(offset + max_rel, 0, 2 * max_rel).astype(jnp.int32)
    E_positional = params["W_pos"][d] + params["b_pos"]          # one-hot @ W == gather

    d_chains = (chain_labels[:, :, None] - chain_labels[:, None, :] == 0).astype(jnp.int32)
    E_chains_idx = gather_edges(d_chains[..., None], E_idx)[..., 0]
    E_chains = params["W_chains"][E_chains_idx] + params["b_chains"]  # one-hot(2) @ W

    # ---- node path: tiny (Din=6); plain XLA fuses matmul+LN for free --------
    V = _dihedrals(X, dihedral_mask)                             # [B,L,6]
    V = _linear_layernorm_ref(V, params["W_node"], params["b_node"],
                              params["g_node"], params["be_node"])

    # ---- edge path: fused Pallas kernel, concat never materialized ----------
    B_, L_, K_ = E_idx.shape
    M = B_ * L_ * K_
    nch = params["W_chains"].shape[1]
    npos = params["W_pos"].shape[1]
    nrbf_all = RBF_all.shape[-1]
    W_edge = params["W_edge"]                                    # rows: [ch|pos|rbf|ori]
    w_segments = [
        W_edge[0:nch],
        W_edge[nch:nch + npos],
        W_edge[nch + npos:nch + npos + nrbf_all],
        W_edge[nch + npos + nrbf_all:],
    ]
    x_segments = [
        E_chains.reshape(M, -1),
        E_positional.reshape(M, -1),
        RBF_all.reshape(M, -1),
        O_features_all.reshape(M, -1),
    ]
    E = edge_linear_layernorm(x_segments, w_segments,
                              params["b_edge"], params["g_edge"],
                              params["be_edge"],
                              block_m=edge_block_m).reshape(B_, L_, K_, -1)
    return V, E, E_idx


# ----------------------------------------------------------------------------
# Deterministic parameter init (PyTorch-style uniform fan-in init)
# ----------------------------------------------------------------------------
def init_params(key, node_features=32, edge_features=32,
                num_pos=16, num_rbf=16, num_chain=16):
    node_in = 6
    edge_in = num_pos + num_rbf * 15 + 7 * 11 + num_chain        # 349
    ks = jax.random.split(key, 4)

    def lin(k, fi, fo):
        lim = fi ** -0.5
        kw, kb = jax.random.split(k)
        W = jax.random.uniform(kw, (fi, fo), jnp.float32, -lim, lim)
        b = jax.random.uniform(kb, (fo,), jnp.float32, -lim, lim)
        return W, b

    W_pos, b_pos = lin(ks[0], 2 * 32 + 1, num_pos)
    W_chains, b_chains = lin(ks[1], 2, num_chain)
    W_node, b_node = lin(ks[2], node_in, node_features)
    W_edge, b_edge = lin(ks[3], edge_in, edge_features)
    return dict(
        W_pos=W_pos, b_pos=b_pos,
        W_chains=W_chains, b_chains=b_chains,
        W_node=W_node, b_node=b_node,
        g_node=jnp.ones((node_features,), jnp.float32),
        be_node=jnp.zeros((node_features,), jnp.float32),
        W_edge=W_edge, b_edge=b_edge,
        g_edge=jnp.ones((edge_features,), jnp.float32),
        be_edge=jnp.zeros((edge_features,), jnp.float32),
    )


if __name__ == "__main__":
    B, L = 2, 8
    key = jax.random.PRNGKey(0)
    kx, kp, kchk = jax.random.split(key, 3)
    X = jax.random.normal(kx, (B, L, 4, 3), jnp.float32) * 3.0   # [B,L,atoms,xyz]
    mask = jnp.ones((B, L), jnp.float32)
    residue_idx = jnp.tile(jnp.arange(L, dtype=jnp.int32)[None, :], (B, 1))
    dihedral_mask = jnp.ones((B, L, 1), jnp.float32)
    chain_labels = jnp.zeros((B, L), jnp.int32)
    L_arg = jnp.full((B,), L, jnp.int32)                          # unused by forward

    params = init_params(kp)

    # --- kernel-level correctness check (bf16 streaming vs f32 reference) ----
    widths = (16, 16, 240, 77)
    Mchk = 200                                   # exercises a ragged last block
    kxs = jax.random.split(kchk, len(widths) + 1)
    xs_chk = [jax.random.normal(kxs[i], (Mchk, w), jnp.float32)
              for i, w in enumerate(widths)]
    splits = [0, 16, 32, 272, 349]
    ws_chk = [params["W_edge"][splits[i]:splits[i + 1]] for i in range(4)]
    e_kern = edge_linear_layernorm(xs_chk, ws_chk, params["b_edge"],
                                   params["g_edge"], params["be_edge"],
                                   block_m=128)
    e_ref = _linear_layernorm_ref(jnp.concatenate(xs_chk, -1), params["W_edge"],
                                  params["b_edge"], params["g_edge"],
                                  params["be_edge"])
    max_err = float(jnp.max(jnp.abs(e_kern - e_ref)))
    assert max_err < 0.1, f"edge kernel mismatch: {max_err}"

    # --- full forward ---------------------------------------------------------
    fwd = jax.jit(functools.partial(protein_features_forward, top_k=30, num_rbf=16))
    V, E, E_idx = fwd(params, X, L_arg, mask, residue_idx, dihedral_mask, chain_labels)
    jax.block_until_ready((V, E, E_idx))

    assert V.shape == (B, L, 32)
    assert E.shape == (B, L, min(30, L), 32)
    assert E_idx.shape == (B, L, min(30, L))
    print("KERNEL_OK")
</pallas_src>

<mosaic_0001>
module attributes {stable_mosaic.version = 11 : i64} {
  func.func @kernel(%arg0: i32, %arg1: memref<128x16xbf16, #tpu.memory_space<vmem>>, %arg2: memref<128x16xbf16, #tpu.memory_space<vmem>>, %arg3: memref<128x240xbf16, #tpu.memory_space<vmem>>, %arg4: memref<128x77xbf16, #tpu.memory_space<vmem>>, %arg5: memref<16x32xbf16, #tpu.memory_space<vmem>>, %arg6: memref<16x32xbf16, #tpu.memory_space<vmem>>, %arg7: memref<240x32xbf16, #tpu.memory_space<vmem>>, %arg8: memref<77x32xbf16, #tpu.memory_space<vmem>>, %arg9: memref<1x32xf32, #tpu.memory_space<vmem>>, %arg10: memref<1x32xf32, #tpu.memory_space<vmem>>, %arg11: memref<1x32xf32, #tpu.memory_space<vmem>>, %arg12: memref<128x32xf32, #tpu.memory_space<vmem>>) attributes {dimension_semantics = [#tpu.dimension_semantics<parallel>], iteration_bounds = array<i64: 2>, scalar_prefetch = 0 : i64, scratch_operands = 0 : i64, tpu.core_type = #tpu.core_type<tc>, window_params = [{transform_indices = @transform_0, window_bounds = array<i64: 128, 16>}, {transform_indices = @transform_1, window_bounds = array<i64: 128, 16>}, {transform_indices = @transform_2, window_bounds = array<i64: 128, 240>}, {transform_indices = @transform_3, window_bounds = array<i64: 128, 77>}, {pipeline_mode = #tpu.pipeline_mode<synchronous>, transform_indices = @transform_4, window_bounds = array<i64: 16, 32>}, {pipeline_mode = #tpu.pipeline_mode<synchronous>, transform_indices = @transform_5, window_bounds = array<i64: 16, 32>}, {pipeline_mode = #tpu.pipeline_mode<synchronous>, transform_indices = @transform_6, window_bounds = array<i64: 240, 32>}, {pipeline_mode = #tpu.pipeline_mode<synchronous>, transform_indices = @transform_7, window_bounds = array<i64: 77, 32>}, {pipeline_mode = #tpu.pipeline_mode<synchronous>, transform_indices = @transform_8, window_bounds = array<i64: 1, 32>}, {pipeline_mode = #tpu.pipeline_mode<synchronous>, transform_indices = @transform_9, window_bounds = array<i64: 1, 32>}, {pipeline_mode = #tpu.pipeline_mode<synchronous>, transform_indices = @transform_10, window_bounds = array<i64: 1, 32>}, {transform_indices = @transform_11, window_bounds = array<i64: 128, 32>}]} {
    %c0 = arith.constant 0 : index
    %c0_0 = arith.constant 0 : index
    %0 = vector.load %arg1[%c0, %c0_0] : memref<128x16xbf16, #tpu.memory_space<vmem>>, vector<128x16xbf16>
    %c0_1 = arith.constant 0 : index
    %c0_2 = arith.constant 0 : index
    %1 = vector.load %arg5[%c0_1, %c0_2] : memref<16x32xbf16, #tpu.memory_space<vmem>>, vector<16x32xbf16>
    %cst = arith.constant dense<0.000000e+00> : vector<128x32xf32>
    %2 = tpu.matmul %0, %1, %cst {dimension_numbers = #tpu.dot_dimension_numbers<[1], [0], [0], [1], [0, 0, 1, 1], [], []>} : vector<128x16xbf16>, vector<16x32xbf16>, vector<128x32xf32> -> vector<128x32xf32>
    %c0_3 = arith.constant 0 : index
    %c0_4 = arith.constant 0 : index
    %3 = vector.load %arg2[%c0_3, %c0_4] : memref<128x16xbf16, #tpu.memory_space<vmem>>, vector<128x16xbf16>
    %c0_5 = arith.constant 0 : index
    %c0_6 = arith.constant 0 : index
    %4 = vector.load %arg6[%c0_5, %c0_6] : memref<16x32xbf16, #tpu.memory_space<vmem>>, vector<16x32xbf16>
    %cst_7 = arith.constant dense<0.000000e+00> : vector<128x32xf32>
    %5 = tpu.matmul %3, %4, %cst_7 {dimension_numbers = #tpu.dot_dimension_numbers<[1], [0], [0], [1], [0, 0, 1, 1], [], []>} : vector<128x16xbf16>, vector<16x32xbf16>, vector<128x32xf32> -> vector<128x32xf32>
    %6 = arith.addf %2, %5 : vector<128x32xf32>
    %c0_8 = arith.constant 0 : index
    %c0_9 = arith.constant 0 : index
    %7 = vector.load %arg3[%c0_8, %c0_9] : memref<128x240xbf16, #tpu.memory_space<vmem>>, vector<128x240xbf16>
    %c0_10 = arith.constant 0 : index
    %c0_11 = arith.constant 0 : index
    %8 = vector.load %arg7[%c0_10, %c0_11] : memref<240x32xbf16, #tpu.memory_space<vmem>>, vector<240x32xbf16>
    %cst_12 = arith.constant dense<0.000000e+00> : vector<128x32xf32>
    %9 = tpu.matmul %7, %8, %cst_12 {dimension_numbers = #tpu.dot_dimension_numbers<[1], [0], [0], [1], [0, 0, 1, 1], [], []>} : vector<128x240xbf16>, vector<240x32xbf16>, vector<128x32xf32> -> vector<128x32xf32>
    %10 = arith.addf %6, %9 : vector<128x32xf32>
    %c0_13 = arith.constant 0 : index
    %c0_14 = arith.constant 0 : index
    %11 = vector.load %arg4[%c0_13, %c0_14] : memref<128x77xbf16, #tpu.memory_space<vmem>>, vector<128x77xbf16>
    %c0_15 = arith.constant 0 : index
    %c0_16 = arith.constant 0 : index
    %12 = vector.load %arg8[%c0_15, %c0_16] : memref<77x32xbf16, #tpu.memory_space<vmem>>, vector<77x32xbf16>
    %cst_17 = arith.constant dense<0.000000e+00> : vector<128x32xf32>
    %13 = tpu.matmul %11, %12, %cst_17 {dimension_numbers = #tpu.dot_dimension_numbers<[1], [0], [0], [1], [0, 0, 1, 1], [], []>} : vector<128x77xbf16>, vector<77x32xbf16>, vector<128x32xf32> -> vector<128x32xf32>
    %14 = arith.addf %10, %13 : vector<128x32xf32>
    %c0_18 = arith.constant 0 : index
    %c0_19 = arith.constant 0 : index
    %15 = vector.load %arg9[%c0_18, %c0_19] : memref<1x32xf32, #tpu.memory_space<vmem>>, vector<1x32xf32>
    %16 = vector.broadcast %15 : vector<1x32xf32> to vector<128x32xf32>
    %17 = arith.addf %14, %16 : vector<128x32xf32>
    %cst_20 = arith.constant dense<0.000000e+00> : vector<128xf32>
    %18 = vector.multi_reduction <add>, %17, %cst_20 [1] : vector<128x32xf32> to vector<128xf32>
    %19 = vector.shape_cast %18 : vector<128xf32> to vector<128x1xf32>
    %cst_21 = arith.constant 3.200000e+01 : f32
    %20 = vector.broadcast %cst_21 : f32 to vector<128x1xf32>
    %21 = arith.divf %19, %20 : vector<128x1xf32>
    %22 = vector.broadcast %21 : vector<128x1xf32> to vector<128x32xf32>
    %23 = arith.subf %17, %22 : vector<128x32xf32>
    %24 = arith.mulf %23, %23 : vector<128x32xf32>
    %cst_22 = arith.constant dense<0.000000e+00> : vector<128xf32>
    %25 = vector.multi_reduction <add>, %24, %cst_22 [1] : vector<128x32xf32> to vector<128xf32>
    %26 = vector.shape_cast %25 : vector<128xf32> to vector<128x1xf32>
    %cst_23 = arith.constant 3.200000e+01 : f32
    %27 = vector.broadcast %cst_23 : f32 to vector<128x1xf32>
    %28 = arith.divf %26, %27 : vector<128x1xf32>
    %cst_24 = arith.constant 9.99999974E-6 : f32
    %29 = vector.broadcast %cst_24 : f32 to vector<128x1xf32>
    %30 = arith.addf %28, %29 : vector<128x1xf32>
    %31 = math.rsqrt %30 : vector<128x1xf32>
    %32 = vector.broadcast %31 : vector<128x1xf32> to vector<128x32xf32>
    %33 = arith.mulf %23, %32 : vector<128x32xf32>
    %c0_25 = arith.constant 0 : index
    %c0_26 = arith.constant 0 : index
    %34 = vector.load %arg10[%c0_25, %c0_26] : memref<1x32xf32, #tpu.memory_space<vmem>>, vector<1x32xf32>
    %35 = vector.broadcast %34 : vector<1x32xf32> to vector<128x32xf32>
    %36 = arith.mulf %33, %35 : vector<128x32xf32>
    %c0_27 = arith.constant 0 : index
    %c0_28 = arith.constant 0 : index
    %37 = vector.load %arg11[%c0_27, %c0_28] : memref<1x32xf32, #tpu.memory_space<vmem>>, vector<1x32xf32>
    %38 = vector.broadcast %37 : vector<1x32xf32> to vector<128x32xf32>
    %39 = arith.addf %36, %38 : vector<128x32xf32>
    %c0_29 = arith.constant 0 : index
    %c0_30 = arith.constant 0 : index
    %40 = vector.load %arg12[%c0_29, %c0_30] : memref<128x32xf32, #tpu.memory_space<vmem>>, vector<128x32xf32>
    tpu.vector_store %arg12[%c0_29, %c0_30], %39 {strides = array<i32>} : memref<128x32xf32, #tpu.memory_space<vmem>>, vector<128x32xf32>,
    return
  }
  func.func @transform_0(%arg0: i32) -> (i32, i32) {
    %c0_i32 = arith.constant 0 : i32
    %c0_i32_0 = arith.constant 0 : i32
    return %arg0, %c0_i32 : i32, i32
  }
  func.func @transform_1(%arg0: i32) -> (i32, i32) {
    %c0_i32 = arith.constant 0 : i32
    %c0_i32_0 = arith.constant 0 : i32
    return %arg0, %c0_i32 : i32, i32
  }
  func.func @transform_2(%arg0: i32) -> (i32, i32) {
    %c0_i32 = arith.constant 0 : i32
    %c0_i32_0 = arith.constant 0 : i32
    return %arg0, %c0_i32 : i32, i32
  }
  func.func @transform_3(%arg0: i32) -> (i32, i32) {
    %c0_i32 = arith.constant 0 : i32
    %c0_i32_0 = arith.constant 0 : i32
    return %arg0, %c0_i32 : i32, i32
  }
  func.func @transform_4(%arg0: i32) -> (i32, i32) {
    %c0_i32 = arith.constant 0 : i32
    %c0_i32_0 = arith.constant 0 : i32
    %c0_i32_1 = arith.constant 0 : i32
    return %c0_i32, %c0_i32_0 : i32, i32
  }
  func.func @transform_5(%arg0: i32) -> (i32, i32) {
    %c0_i32 = arith.constant 0 : i32
    %c0_i32_0 = arith.constant 0 : i32
    %c0_i32_1 = arith.constant 0 : i32
    return %c0_i32, %c0_i32_0 : i32, i32
  }
  func.func @transform_6(%arg0: i32) -> (i32, i32) {
    %c0_i32 = arith.constant 0 : i32
    %c0_i32_0 = arith.constant 0 : i32
    %c0_i32_1 = arith.constant 0 : i32
    return %c0_i32, %c0_i32_0 : i32, i32
  }
  func.func @transform_7(%arg0: i32) -> (i32, i32) {
    %c0_i32 = arith.constant 0 : i32
    %c0_i32_0 = arith.constant 0 : i32
    %c0_i32_1 = arith.constant 0 : i32
    return %c0_i32, %c0_i32_0 : i32, i32
  }
  func.func @transform_8(%arg0: i32) -> (i32, i32) {
    %c0_i32 = arith.constant 0 : i32
    %c0_i32_0 = arith.constant 0 : i32
    %c0_i32_1 = arith.constant 0 : i32
    return %c0_i32, %c0_i32_0 : i32, i32
  }
  func.func @transform_9(%arg0: i32) -> (i32, i32) {
    %c0_i32 = arith.constant 0 : i32
    %c0_i32_0 = arith.constant 0 : i32
    %c0_i32_1 = arith.constant 0 : i32
    return %c0_i32, %c0_i32_0 : i32, i32
  }
  func.func @transform_10(%arg0: i32) -> (i32, i32) {
    %c0_i32 = arith.constant 0 : i32
    %c0_i32_0 = arith.constant 0 : i32
    %c0_i32_1 = arith.constant 0 : i32
    return %c0_i32, %c0_i32_0 : i32, i32
  }
  func.func @transform_11(%arg0: i32) -> (i32, i32) {
    %c0_i32 = arith.constant 0 : i32
    %c0_i32_0 = arith.constant 0 : i32
    return %arg0, %c0_i32 : i32, i32
  }
}

</mosaic_0001>

<bundles_post_ra>
// kernel: tpu_custom_call.1
= control target key start
LH: loop header
LB: loop body
LE: loop exit
PB: predicated region body
PF: predicated region fallthrough
CT: control target
= control target key end

     0   :  { %s2689_s17 = smov 0   ;;  %s2691_s18 = smov 0   ;;  %s3303_s0 = inlined_call_operand.vmem [shape: bf16[200,16], index: 0, kind: input, shape index: {}]   ;;  %s3304_s1 = inlined_call_operand.vmem [shape: bf16[200,16], index: 1, kind: input, shape index: {}]   ;;  %s3305_s2 = inlined_call_operand.vmem [shape: bf16[200,240], index: 2, kind: input, shape index: {}]   ;;  %s3306_s3 = inlined_call_operand.vmem [shape: bf16[200,77], index: 3, kind: input, shape index: {}]   ;;  %s3307_s4 = inlined_call_operand.vmem [shape: bf16[16,32], index: 4, kind: input, shape index: {}]   ;;  %s3308_s5 = inlined_call_operand.vmem [shape: bf16[16,32], index: 5, kind: input, shape index: {}]   ;;  %s3309_s6 = inlined_call_operand.vmem [shape: bf16[240,32], index: 6, kind: input, shape index: {}]   ;;  %s3310_s7 = inlined_call_operand.vmem [shape: bf16[77,32], index: 7, kind: input, shape index: {}]   ;;  %s3311_s8 = inlined_call_operand.vmem [shape: f32[1,32], index: 8, kind: input, shape index: {}]   ;;  %s3312_s9 = inlined_call_operand.vmem [shape: f32[1,32], index: 9, kind: input, shape index: {}]   ;;  %s3313_s10 = inlined_call_operand.vmem [shape: f32[1,32], index: 10, kind: input, shape index: {}]   ;;  %s3314_s11 = inlined_call_operand.vmem [shape: f32[200,32], index: 11, kind: output, shape index: {}]  }
   0x1   :  { %s2693_s19 = smov 0  }
   0x2 LB: > { %s2702_s20 = sadd.s32 4294967295, %s2593_s19   ;;  %s2704_s21 = sadd.s32 1, %s2593_s19   ;;  %s2593_s19 = sphi %s2693_s19, %s3321_s19   ;;  %s2589_s18 = sphi %s2691_s18, %s3320_s18   ;;  %s2585_s17 = sphi %s2689_s17, %s3319_s17  }
   0x3   : > { %s276_s22 = ssub.s32 %s2593_s19, %s2704_s21  ;;  %s279_s23 = sadd.s32 1, %s2589_s18 }
   0x4   : > { %p277_p0 = scmp.eq.s32.totalorder %s276_s22, 0  ;;  %p289_p1 = scmp.ne.s32.totalorder %s2589_s18, %s2585_s17 }
   0x5   : > { %p290_p2 = scmp.eq.s32.totalorder %s2702_s20, 1  ;;  %p2109_p3 = scmp.ge.s32.totalorder %s2593_s19, 1 }
   0x6   : > { %s2712_s24 = scalar_select %p277_p0, %s2589_s18, %s279_s23  }
   0x7   : > { %p2714_p4 = por %p290_p2, %p289_p1  ;;  %p406_p5 = scmp.lt.s32.totalorder %s2593_s19, 3 }
   0x9   : > { %p407_p6 = pnand %p2109_p3, %p406_p5 }
   0xa   : > { %v2437_v0 = vld [vmem:[%s3309_s6] sm:$0xff] (!%p407_p6)   ;;  %v2627_v1 = vmov (!%p407_p6), 0   ;;  %s2726_s30 = sshll.u32 (!%p407_p6), %s2702_s20, 4  ;;  %v2439_v3 = vld [vmem:[%s3309_s6 + $0x8] sm:$0xff] (!%p407_p6)   ;;  %v2442_v4 = vld [vmem:[%s3309_s6 + $0x10] sm:$0xff] (!%p407_p6)   ;;  %vm625_vm0 = vcmask (!%p407_p6), 130048  }
   0xb   : > { %410 = sbr.rel (%p407_p6) target bundleno = 710 (0x2c6), region = 64  ;;  %1147 = vmatprep.subr.bf16.mxu1 (!%p407_p6), %v2627_v1  ;;  %v2438_v2 = vld [vmem:[%s3308_s5] sm:$0xff] (!%p407_p6)   ;;  %p483_p7 = scmp.lt.s32.totalorder (!%p407_p6), %s2726_s30, 24  ;;  %v2443_v7 = vld [vmem:[%s3309_s6 + $0x18] sm:$0xff] (!%p407_p6)   ;;  %v2447_v13 = vld [vmem:[%s3309_s6 + $0x28] sm:$0xff] (!%p407_p6)   ;;  %vm1122_vm1 = vcmask (!%p407_p6), 916480  }
   0xc   : > { %1148 = vmatpush1.bf16.msra.mxu1 (!%p407_p6), %v2437_v0  ;;  %2269 = vmatprep.subr.bf16.mxu0 (!%p407_p6), %v2438_v2  ;;  %v2448_v5 = vld [vmem:[%s3307_s4] sm:$0xff] (!%p407_p6)   ;;  %v2451_v14 = vld [vmem:[%s3309_s6 + $0x30] sm:$0xff] (!%p407_p6)   ;;  %v2452_v17 = vld [vmem:[%s3309_s6 + $0x38] sm:$0xff] (!%p407_p6)   ;;  %vm1380_vm2 = vcmask (!%p407_p6), 1045504   ;;  %vm1381_vm3 = vcmask (!%p407_p6), 1046528   ;;  %v2628_v32 = vmov (!%p407_p6), 65535  }
   0xd   : > { %1149 = vmatprep.subr.bf16.mxu1 (!%p407_p6), %v2627_v1  ;;  %2270 = vmatpush3.bf16.msra.mxu0 (!%p407_p6), %v2438_v2  ;;  %v2446_v10 = vld [vmem:[%s3309_s6 + $0x20] sm:$0xff] (!%p407_p6)   ;;  %v2456_v22 = vld [vmem:[%s3309_s6 + $0x48] sm:$0xff] (!%p407_p6)   ;;  %v2459_v24 = vld [vmem:[%s3309_s6 + $0x50] sm:$0xff] (!%p407_p6)   ;;  %v1382_v33 = vsel (!%p407_p6), %vm1380_vm2, 4294967295, %v2628_v32  ;;  %vm1355_vm4 = vcmask (!%p407_p6), 629760   ;;  %vm1523_vm5 = vcmask (!%p407_p6), 261120  }
   0xe   : > { %2287 = vmatprep.subr.bf16.mxu0 (!%p407_p6), %v2448_v5  ;;  %v2465_v18 = vld [vmem:[%s3310_s7] sm:$0xff] (!%p407_p6)   ;;  %v2469_v27 = vld [vmem:[%s3310_s7 + $0x8] sm:$0xff] (!%p407_p6)   ;;  %v2460_v28 = vld [vmem:[%s3309_s6 + $0x58] sm:$0xff] (!%p407_p6)   ;;  %v1383_v38 = vsel (!%p407_p6), %vm1381_vm3, %v1382_v33, 0 }
   0xf   : > { %v2455_v19 = vld [vmem:[%s3309_s6 + $0x40] sm:$0xff] (!%p407_p6)   ;;  %v2473_v29 = vld [vmem:[%s3310_s7 + $0x10] sm:$0xff] (!%p407_p6)   ;;  %v2476_v35 = vld [vmem:[%s3310_s7 + $0x18] sm:$0xff] (!%p407_p6)  }
  0x10   : > { %1150 = vmatpush1.bf16.msra.mxu1 (!%p407_p6), %v2439_v3  ;;  %v2463_v30 = vld [vmem:[%s3309_s6 + $0x60] sm:$0xff] (!%p407_p6)   ;;  %v2464_v37 = vld [vmem:[%s3309_s6 + $0x68] sm:$0xff] (!%p407_p6)   ;;  %v2468_v40 = vld [vmem:[%s3309_s6 + $0x70] sm:$0xff] (!%p407_p6)  }
  0x11   : > { %1151 = vmatprep.subr.bf16.mxu1 (!%p407_p6), %v2627_v1  ;;  %v2480_v36 = vld [vmem:[%s3310_s7 + $0x20] sm:$0x7f] (!%p407_p6)  }
  0x12   : > { %s2734_s14 = scalar_select %p483_p7, %s2726_s30, 24  ;;  %v1385_v39 = vand.u32 %v2480_v36, %v1383_v38  ;;  %v2924_v32 = vld [vmem:[%s3311_s8] ss:$0 sm:$0xff] }
  0x13   : > { %s1803_s19 = ssub.s32 (%p2714_p4), 25, %s2726_s30 }
  0x14   : > { %s2737_s15 = sshll.u32 %s2734_s14, 2  ;;  %1152 = vmatpush1.bf16.msra.mxu1 %v2442_v4  ;;  %s2234_s23 = sshll.u32 %s2734_s14, 3 }
  0x15   : > { %s2746_s26 = scalar_lea.vmem %s3304_s1, %s2737_s15  ;;  %1153 = vmatprep.subr.bf16.mxu1 %v2627_v1  ;;  %s2775_s28 = scalar_lea.vmem %s3303_s0, %s2737_s15 }
  0x16   : > { %v2440_v6 = vld [vmem:[%s2746_s26] sm:$0xff]   ;;  %v2441_v8 = vld [vmem:[%s2746_s26 + $0x8] sm:$0xff]   ;;  %v2444_v9 = vld [vmem:[%s2746_s26 + $0x10] sm:$0xff]   ;;  %s2804_s16 = scalar_lea.vmem %s3305_s2, %s2234_s23  ;;  %s2822_s29 = scalar_lea.vmem %s3306_s3, %s2737_s15 }
  0x17   : > { %2271 = vmatprep.mubr.msk.bf16.mxu0 %vm625_vm0, %v2440_v6  ;;  %v2445_v11 = vld [vmem:[%s2746_s26 + $0x18] sm:$0xff]   ;;  %v2449_v12 = vld [vmem:[%s2746_s26 + $0x20] sm:$0xff]   ;;  %v2450_v15 = vld [vmem:[%s2746_s26 + $0x28] sm:$0xff]   ;;  %s2235_s15 = sshll.u32 (%p2714_p4), %s2702_s20, 7  ;;  %p1804_p8 = scmp.lt.s32.totalorder (%p2714_p4), %s1803_s19, 16 }
  0x18   : > { %2272 = vmatmul.mubr.msk.bf16.vlgmr.msra.gmra.mrb[0].mxu0 %vm625_vm0, %v2441_v8  ;;  %1154 = vmatpush1.bf16.msra.mxu1 %v2443_v7  ;;  %v2453_v16 = vld [vmem:[%s2746_s26 + $0x30] sm:$0xff]   ;;  %v2454_v20 = vld [vmem:[%s2746_s26 + $0x38] sm:$0xff]   ;;  %v2457_v21 = vld [vmem:[%s2775_s28] sm:$0xff]  }
  0x19   : > { %2275 = vmatprep.mubr.msk.bf16.mxu0 %vm625_vm0, %v2444_v9  ;;  %2288 = vmatpush3.bf16.msra.mxu0 %v2448_v5  ;;  %v2472_v23 = vld [vmem:[%s2804_s16 + $0x4] ss:$8 sps:$4 sm:$0xff]   ;;  %v2461_v26 = vld [vmem:[%s2775_s28 + $0x10] sm:$0xff]   ;;  %v2462_v31 = vld [vmem:[%s2775_s28 + $0x18] sm:$0xff]  }
  0x1a   : > { %1155 = vmatprep.subr.bf16.mxu1 %v2627_v1  ;;  %2305 = vmatprep.subr.bf16.mxu0 %v2465_v18  ;;  %v2458_v25 = vld [vmem:[%s2775_s28 + $0x8] sm:$0xff]   ;;  %v2466_v34 = vld [vmem:[%s2775_s28 + $0x20] sm:$0xff]   ;;  %v2474_v42 = vld [vmem:[%s2775_s28 + $0x30] sm:$0xff]  }
  0x1b   : > { %2185 = vmatprep.mubr.msk.bf16.mxu1 %vm1122_vm1, %v2472_v23  ;;  %v2467_v41 = vld [vmem:[%s2775_s28 + $0x28] sm:$0xff]   ;;  %v2477_v44 = vld [vmem:[%s2804_s16 + $0x14] ss:$8 sps:$4 sm:$0xff]   ;;  %v2481_v46 = vld [vmem:[%s2822_s29] sm:$0xff]  }
  0x1c   : > { %1156 = vmatpush1.bf16.msra.mxu1 %v2446_v10  ;;  %v2470_v43 = vld [vmem:[%s2804_s16] ss:$8 sps:$4 sm:$0xff]   ;;  %v2475_v45 = vld [vmem:[%s2775_s28 + $0x38] sm:$0xff]   ;;  %v2483_v48 = vld [vmem:[%s2804_s16 + $0x24] ss:$8 sps:$4 sm:$0xff]   ;;  %s3210_s28 = scalar_lea.vmem (%p2714_p4), %s3314_s11, %s2235_s15  }
  0x1d   : > { %1157 = vmatprep.subr.bf16.mxu1 %v2627_v1  ;;  %v2479_v47 = vld [vmem:[%s2804_s16 + $0x10] ss:$8 sps:$4 sm:$0xff]   ;;  %v2482_v49 = vld [vmem:[%s2822_s29 + $0x8] sm:$0xff]   ;;  %v2488_v52 = vld [vmem:[%s2804_s16 + $0x34] ss:$8 sps:$4 sm:$0xff]  }
  0x1e   : > { %v2486_v50 = vld [vmem:[%s2822_s29 + $0x10] sm:$0xff]   ;;  %v2485_v51 = vld [vmem:[%s2804_s16 + $0x20] ss:$8 sps:$4 sm:$0xff]   ;;  %v2487_v53 = vld [vmem:[%s2822_s29 + $0x18] sm:$0xff]  }
  0x1f   : > { %v2494_v54 = vld [vmem:[%s2822_s29 + $0x20] sm:$0xff]   ;;  %v2490_v55 = vld [vmem:[%s2804_s16 + $0x30] ss:$8 sps:$4 sm:$0xff]   ;;  %v2495_v57 = vld [vmem:[%s2822_s29 + $0x28] sm:$0xff]  }
  0x20   : > { %2276 = vmatmul.mubr.msk.bf16.gmra.mrb[4].mxu0 %vm625_vm0, %v2445_v11  ;;  %1158 = vmatpush1.bf16.msra.mxu1 %v2447_v13  ;;  %v2491_v56 = vld [vmem:[%s2804_s16 + $0x44] ss:$8 sps:$4 sm:$0xff]   ;;  %v2502_v58 = vld [vmem:[%s2822_s29 + $0x30] sm:$0xff]   ;;  %v2493_v59 = vld [vmem:[%s2804_s16 + $0x40] ss:$8 sps:$4 sm:$0xff]  }
  0x21   : > { %2279 = vmatprep.mubr.msk.bf16.mxu0 %vm625_vm0, %v2449_v12  ;;  %1159 = vmatprep.subr.bf16.mxu1 %v2627_v1  ;;  %v2496_v60 = vld [vmem:[%s2804_s16 + $0x54] ss:$8 sps:$4 sm:$0xff]   ;;  %v2498_v62 = vld [vmem:[%s2804_s16 + $0x50] ss:$8 sps:$4 sm:$0xff]   ;;  %v2499_v63 = vld [vmem:[%s2804_s16 + $0x64] ss:$8 sps:$4 sm:$0xff]  }
  0x22   : > { %v2503_v61 = vld [vmem:[%s2822_s29 + $0x38] sm:$0xff]   ;;  %v2501_v0 = vld [vmem:[%s2804_s16 + $0x60] ss:$8 sps:$4 sm:$0xff]   ;;  %s475_s29 = sand.u32 1, %s2585_s17  }
  0x23   : > { %v2506_v2 = vld [vmem:[%s2804_s16 + $0x70] ss:$8 sps:$4 sm:$0xff]   ;;  %s2110_s12 = sshll.u32 %s475_s29, 7 }
  0x24   : > { %1160 = vmatpush1.bf16.msra.mxu1 %v2451_v14  ;;  %s3126_s17 = scalar_lea.vmem [#allocation2], %s2110_s12  }
  0x25   : > { %1161 = vmatprep.subr.bf16.mxu1 %v2627_v1 }
  0x28   : > { %2280 = vmatmul.mubr.msk.bf16.gmra.mrb[8].mxu0 %vm625_vm0, %v2450_v15  ;;  %1162 = vmatpush1.bf16.msra.mxu1 %v2452_v17 }
  0x29   : > { %2283 = vmatprep.mubr.msk.bf16.mxu0 %vm625_vm0, %v2453_v16  ;;  %1163 = vmatprep.subr.bf16.mxu1 %v2627_v1 }
  0x2c   : > { %1164 = vmatpush1.bf16.msra.mxu1 %v2455_v19 }
  0x2d   : > { %1165 = vmatprep.subr.bf16.mxu1 %v2627_v1 }
  0x30   : > { %2284 = vmatmul.mubr.msk.bf16.gmra.mrb[12].mxu0 %vm625_vm0, %v2454_v20  ;;  %1166 = vmatpush1.bf16.msra.mxu1 %v2456_v22 }
  0x31   : > { %2289 = vmatprep.mubr.msk.bf16.mxu0 %vm625_vm0, %v2457_v21  ;;  %1167 = vmatprep.subr.bf16.mxu1 %v2627_v1 }
  0x34   : > { %1168 = vmatpush1.bf16.msra.mxu1 %v2459_v24 }
  0x35   : > { %1169 = vmatprep.subr.bf16.mxu1 %v2627_v1 }
  0x38   : > { %2290 = vmatmul.mubr.msk.bf16.vlgmr.msra.gmra.mrb[0].mxu0 %vm625_vm0, %v2458_v25  ;;  %1170 = vmatpush1.bf16.msra.mxu1 %v2460_v28 }
  0x39   : > { %2293 = vmatprep.mubr.msk.bf16.mxu0 %vm625_vm0, %v2461_v26  ;;  %2306 = vmatpush3.bf16.msra.mxu0 %v2465_v18 }
  0x3a   : > { %2307 = vmatprep.subr.bf16.mxu0 %v2469_v27  ;;  %1171 = vmatprep.subr.bf16.mxu1 %v2627_v1 }
  0x3c   : > { %1172 = vmatpush1.bf16.msra.mxu1 %v2463_v30 }
  0x3d   : > { %2308 = vmatpush3.bf16.msra.mxu0 %v2469_v27  ;;  %1173 = vmatprep.subr.bf16.mxu1 %v2627_v1 }
  0x3e   : > { %2309 = vmatprep.subr.bf16.mxu0 %v2473_v29 }
  0x40   : > { %2294 = vmatmul.mubr.msk.bf16.gmra.mrb[4].mxu0 %vm625_vm0, %v2462_v31  ;;  %1174 = vmatpush1.bf16.msra.mxu1 %v2464_v37 }
  0x41   : > { %2297 = vmatprep.mubr.msk.bf16.mxu0 %vm625_vm0, %v2466_v34  ;;  %2310 = vmatpush3.bf16.msra.mxu0 %v2473_v29 }
  0x42   : > { %2311 = vmatprep.subr.bf16.mxu0 %v2476_v35  ;;  %1175 = vmatprep.subr.bf16.mxu1 %v2627_v1  ;;  %v2504_v1 = vld [vmem:[%s2804_s16 + $0x74] ss:$8 sps:$4 sm:$0xff]  }
  0x44   : > { %1176 = vmatpush1.bf16.msra.mxu1 %v2468_v40 }
  0x45   : > { %2312 = vmatpush3.bf16.msra.mxu0 %v2476_v35 }
  0x46   : > { %2313 = vmatprep.subr.bf16.mxu0 %v1385_v39 }
  0x47   : > { %1180 = vmatmul.mubr.bf16.vlgmr.msra.gmra.mrb[0].mxu1 %v2470_v43 }
  0x48   : > { %2298 = vmatmul.mubr.msk.bf16.gmra.mrb[8].mxu0 %vm625_vm0, %v2467_v41  ;;  %2186 = vmatprep.mubr.msk.bf16.mxu1 %vm1122_vm1, %v2477_v44 }
  0x49   : > { %2301 = vmatprep.mubr.msk.bf16.mxu0 %vm625_vm0, %v2474_v42  ;;  %2314 = vmatpush3.bf16.msra.mxu0 %v1385_v39 }
  0x4f   : > { %1188 = vmatmul.mubr.bf16.gmra.mrb[4].mxu1 %v2479_v47 }
  0x50   : > { %2302 = vmatmul.mubr.msk.bf16.gmra.mrb[12].mxu0 %vm625_vm0, %v2475_v45  ;;  %2187 = vmatprep.mubr.msk.bf16.mxu1 %vm1122_vm1, %v2483_v48 }
  0x51   : > { %2315 = vmatprep.mubr.msk.bf16.mxu0 %vm1355_vm4, %v2481_v46 }
  0x57   : > { %1196 = vmatmul.mubr.bf16.gmra.mrb[8].mxu1 %v2485_v51 }
  0x58   : > { %2316 = vmatmul.mubr.msk.bf16.vlgmr.msra.gmra.mrb[16].mxu0 %vm1355_vm4, %v2482_v49  ;;  %2188 = vmatprep.mubr.msk.bf16.mxu1 %vm1122_vm1, %v2488_v52 }
  0x59   : > { %2319 = vmatprep.mubr.msk.bf16.mxu0 %vm1355_vm4, %v2486_v50 }
  0x5f   : > { %1204 = vmatmul.mubr.bf16.gmra.mrb[12].mxu1 %v2490_v55 }
  0x60   : > { %2320 = vmatmul.mubr.msk.bf16.gmra.mrb[20].mxu0 %vm1355_vm4, %v2487_v53  ;;  %2189 = vmatprep.mubr.msk.bf16.mxu1 %vm1122_vm1, %v2491_v56 }
  0x61   : > { %2323 = vmatprep.mubr.msk.bf16.mxu0 %vm1355_vm4, %v2494_v54 }
  0x67   : > { %1212 = vmatmul.mubr.bf16.gmra.mrb[16].mxu1 %v2493_v59 }
  0x68   : > { %2324 = vmatmul.mubr.msk.bf16.gmra.mrb[24].mxu0 %vm1355_vm4, %v2495_v57  ;;  %2190 = vmatprep.mubr.msk.bf16.mxu1 %vm1122_vm1, %v2496_v60 }
  0x69   : > { %2327 = vmatprep.mubr.msk.bf16.mxu0 %vm1355_vm4, %v2502_v58 }
  0x6f   : > { %1220 = vmatmul.mubr.bf16.gmra.mrb[20].mxu1 %v2498_v62 }
  0x70   : > { %2328 = vmatmul.mubr.msk.bf16.gmra.mrb[28].mxu0 %vm1355_vm4, %v2503_v61  ;;  %2191 = vmatprep.mubr.msk.bf16.mxu1 %vm1122_vm1, %v2499_v63 }
  0x77   : > { %1228 = vmatmul.mubr.bf16.gmra.mrb[24].mxu1 %v2501_v0 }
  0x78   : > { %2192 = vmatprep.mubr.msk.bf16.mxu1 %vm1122_vm1, %v2504_v1 }
  0x7f   : > { %1236 = vmatmul.mubr.bf16.gmra.mrb[28].mxu1 %v2506_v2 }
 0x10b   : > { %v2291_v3 = vpop.f32.mrb[0].mxu0 }
 0x10c   : > { %v851_v4 = vpop.f32.mrb[1].mxu0 }
 0x10d   : > { %v2292_v5 = vpop.f32.mrb[2].mxu0 }
 0x10e   : > { %v854_v6 = vpop.f32.mrb[3].mxu0 }
 0x113   : > { %v2295_v7 = vpop.f32.mrb[4].mxu0 }
 0x114   : > { %v867_v8 = vpop.f32.mrb[5].mxu0 }
 0x115   : > { %v2296_v9 = vpop.f32.mrb[6].mxu0 }
 0x116   : > { %v870_v10 = vpop.f32.mrb[7].mxu0 }
 0x11a   : > { %v1181_v14 = vpop.f32.mrb[0].mxu1 }
 0x11b   : > { %v2905_v11 = vpop.f32.mrb[8].mxu0  ;;  %v1244_v16 = vadd.f32 %v1181_v14, %v851_v4  ;;  %v1183_v17 = vpop.f32.mrb[1].mxu1 }
 0x11c   : > { %v2907_v12 = vpop.f32.mrb[9].mxu0  ;;  %v1184_v18 = vpop.f32.mrb[2].mxu1 }
 0x11d   : > { %v2909_v13 = vpop.f32.mrb[10].mxu0  ;;  %v1245_v19 = vadd.f32 %v1184_v18, %v854_v6  ;;  %v1186_v20 = vpop.f32.mrb[3].mxu1 }
 0x11e   : > { %v2911_v15 = vpop.f32.mrb[11].mxu0 }
 0x122   : > { %v1189_v24 = vpop.f32.mrb[4].mxu1 }
 0x123   : > { %v2913_v21 = vpop.f32.mrb[12].mxu0  ;;  %v1246_v26 = vadd.f32 %v2291_v3, %v1189_v24  ;;  %v1191_v27 = vpop.f32.mrb[5].mxu1 }
 0x124   : > { %v2915_v22 = vpop.f32.mrb[13].mxu0  ;;  %v1192_v28 = vpop.f32.mrb[6].mxu1 }
 0x125   : > { %v2917_v23 = vpop.f32.mrb[14].mxu0  ;;  %v1247_v29 = vadd.f32 %v2292_v5, %v1192_v28  ;;  %v1194_v30 = vpop.f32.mrb[7].mxu1 }
 0x126   : > { %v2919_v25 = vpop.f32.mrb[15].mxu0 }
 0x12a   : > { %v1197_v37 = vpop.f32.mrb[8].mxu1 }
 0x12b   : > { %v2317_v31 = vpop.f32.mrb[16].mxu0  ;;  %v1248_v39 = vadd.f32 %v1197_v37, %v867_v8  ;;  %v1199_v41 = vpop.f32.mrb[9].mxu1 }
 0x12c   : > { %v1486_v33 = vadd.f32 %v2317_v31, %v1246_v26  ;;  %v1421_v34 = vpop.f32.mrb[17].mxu0  ;;  %v1200_v44 = vpop.f32.mrb[10].mxu1 }
 0x12d   : > { %v1484_v35 = vadd.f32 %v1421_v34, %v1244_v16  ;;  %v2318_v36 = vpop.f32.mrb[18].mxu0  ;;  %v1249_v46 = vadd.f32 %v1200_v44, %v870_v10  ;;  %v1202_v47 = vpop.f32.mrb[11].mxu1 }
 0x12e   : > { %v1487_v38 = vadd.f32 %v2318_v36, %v1247_v29  ;;  %v1424_v40 = vpop.f32.mrb[19].mxu0  ;;  %v2927_v42 = vadd.f32 %v2924_v32, %v1486_v33 }
 0x12f   : > { %v1485_v43 = vadd.f32 %v1424_v40, %v1245_v19  ;;  %v2930_v45 = vadd.f32 %v2924_v32, %v1484_v35 }
 0x130   : > { %v1530_v48 = vsel %vm1523_vm5, %v2927_v42, 0.0  ;;  %v2935_v49 = vadd.f32 %v2924_v32, %v1487_v38 }
 0x131   : > { %1531 = vadd.xlane.f32.xlu1 %v1530_v48  ;;  %v1524_v50 = vsel %vm1523_vm5, %v2930_v45, 0.0  ;;  %v2940_v51 = vadd.f32 %v2924_v32, %v1485_v43 }
 0x132   : > { %1525 = vadd.xlane.f32.xlu0 %v1524_v50  ;;  %v1533_v54 = vsel %vm1523_vm5, %v2935_v49, 0.0  ;;  %v1205_v57 = vpop.f32.mrb[12].mxu1 }
 0x133   : > { %v2321_v52 = vpop.f32.mrb[20].mxu0  ;;  %v1527_v58 = vsel %vm1523_vm5, %v2940_v51, 0.0  ;;  %v1250_v59 = vadd.f32 %v2295_v7, %v1205_v57  ;;  %v1207_v61 = vpop.f32.mrb[13].mxu1 }
 0x134   : > { %v1437_v53 = vpop.f32.mrb[21].mxu0  ;;  %v1208_v63 = vpop.f32.mrb[14].mxu1 }
 0x135   : > { %v1488_v55 = vadd.f32 %v1437_v53, %v1248_v39  ;;  %1534 = vadd.xlane.f32.xlu1 %v1533_v54  ;;  %v2322_v56 = vpop.f32.mrb[22].mxu0  ;;  %v1490_v1 = vadd.f32 %v2321_v52, %v1250_v59  ;;  %v1251_v2 = vadd.f32 %v2296_v9, %v1208_v63  ;;  %v1210_v3 = vpop.f32.mrb[15].mxu1 }
 0x136   : > { %1528 = vadd.xlane.f32.xlu0 %v1527_v58  ;;  %v1440_v60 = vpop.f32.mrb[23].mxu0 }
 0x137   : > { %v1489_v62 = vadd.f32 %v1440_v60, %v1249_v46  ;;  %v2947_v0 = vadd.f32 %v2924_v32, %v1488_v55  ;;  %v1491_v6 = vadd.f32 %v2322_v56, %v1251_v2  ;;  %v2955_v7 = vadd.f32 %v2924_v32, %v1490_v1 }
 0x139   : > { %v1536_v4 = vsel %vm1523_vm5, %v2947_v0, 0.0  ;;  %v2952_v5 = vadd.f32 %v2924_v32, %v1489_v62  ;;  %v1542_v9 = vsel %vm1523_vm5, %v2955_v7, 0.0  ;;  %v2962_v14 = vadd.f32 %v2924_v32, %v1491_v6 }
 0x13a   : > { %1537 = vadd.xlane.f32.xlu0 %v1536_v4  ;;  %v1213_v17 = vpop.f32.mrb[16].mxu1 }
 0x13b   : > { %v1539_v8 = vsel %vm1523_vm5, %v2952_v5, 0.0  ;;  %v2325_v10 = vpop.f32.mrb[24].mxu0  ;;  %v1252_v19 = vadd.f32 %v1213_v17, %v2907_v12  ;;  %v1215_v20 = vpop.f32.mrb[17].mxu1  ;;  %v1545_v24 = vsel %vm1523_vm5, %v2962_v14, 0.0 }
 0x13c   : > { %1540 = vadd.xlane.f32.xlu1 %v1539_v8  ;;  %v1453_v16 = vpop.f32.mrb[25].mxu0  ;;  %v1216_v27 = vpop.f32.mrb[18].mxu1 }
 0x13d   : > { %v2326_v18 = vpop.f32.mrb[26].mxu0  ;;  %v1253_v28 = vadd.f32 %v1216_v27, %v2911_v15  ;;  %v1492_v29 = vadd.f32 %v1453_v16, %v1252_v19  ;;  %v1218_v30 = vpop.f32.mrb[19].mxu1 }
 0x13e   : > { %1543 = vadd.xlane.f32.xlu0 %v1542_v9  ;;  %v1456_v26 = vpop.f32.mrb[27].mxu0 }
 0x13f   : > { %v1493_v31 = vadd.f32 %v1456_v26, %v1253_v28  ;;  %v2969_v33 = vadd.f32 %v2924_v32, %v1492_v29 }
 0x140   : > { %1546 = vadd.xlane.f32.xlu1 %v1545_v24 }
 0x141   : > { %v1548_v12 = vsel %vm1523_vm5, %v2969_v33, 0.0  ;;  %v2974_v35 = vadd.f32 %v2924_v32, %v1493_v31 }
 0x142   : > { %v1221_v37 = vpop.f32.mrb[20].mxu1  ;;  %1549 = vadd.xlane.f32.xlu0 %v1548_v12 }
 0x143   : > { %v2329_v34 = vpop.f32.mrb[28].mxu0  ;;  %v1254_v15 = vadd.f32 %v2905_v11, %v1221_v37  ;;  %v1223_v39 = vpop.f32.mrb[21].mxu1  ;;  %v1551_v40 = vsel %vm1523_vm5, %v2974_v35, 0.0 }
 0x144   : > { %v1469_v36 = vpop.f32.mrb[29].mxu0  ;;  %v1224_v43 = vpop.f32.mrb[22].mxu1  ;;  %1552 = vadd.xlane.f32.xlu1 %v1551_v40 }
 0x145   : > { %v2330_v38 = vpop.f32.mrb[30].mxu0  ;;  %v1494_v44 = vadd.f32 %v2325_v10, %v1254_v15  ;;  %v1255_v46 = vadd.f32 %v2909_v13, %v1224_v43  ;;  %v1226_v47 = vpop.f32.mrb[23].mxu1 }
 0x146   : > { %v1472_v41 = vpop.f32.mrb[31].mxu0 }
 0x147   : > { %v1495_v48 = vadd.f32 %v2326_v18, %v1255_v46  ;;  %v2981_v50 = vadd.f32 %v2924_v32, %v1494_v44 }
 0x149   : > { %v1554_v52 = vsel %vm1523_vm5, %v2981_v50, 0.0  ;;  %v2986_v11 = vadd.f32 %v2924_v32, %v1495_v48 }
 0x14a   : > { %v1229_v53 = vpop.f32.mrb[24].mxu1  ;;  %1555 = vadd.xlane.f32.xlu0 %v1554_v52 }
 0x14b   : > { %v1256_v54 = vadd.f32 %v1229_v53, %v2915_v22  ;;  %v1231_v55 = vpop.f32.mrb[25].mxu1  ;;  %v1557_v56 = vsel %vm1523_vm5, %v2986_v11, 0.0 }
 0x14c   : > { %v1232_v13 = vpop.f32.mrb[26].mxu1  ;;  %1558 = vadd.xlane.f32.xlu1 %v1557_v56 }
 0x14d   : > { %v1257_v57 = vadd.f32 %v1232_v13, %v2919_v25  ;;  %v1496_v58 = vadd.f32 %v1469_v36, %v1256_v54  ;;  %v1234_v59 = vpop.f32.mrb[27].mxu1 }
 0x14f   : > { %v1497_v60 = vadd.f32 %v1472_v41, %v1257_v57  ;;  %v2993_v61 = vadd.f32 %v2924_v32, %v1496_v58 }
 0x151   : > { %v1560_v62 = vsel %vm1523_vm5, %v2993_v61, 0.0  ;;  %v2998_v63 = vadd.f32 %v2924_v32, %v1497_v60 }
 0x152   : > { %v1237_v22 = vpop.f32.mrb[28].mxu1  ;;  %1561 = vadd.xlane.f32.xlu0 %v1560_v62 }
 0x153   : > { %v1258_v1 = vadd.f32 %v2913_v21, %v1237_v22  ;;  %v1239_v2 = vpop.f32.mrb[29].mxu1  ;;  %v1563_v25 = vsel %vm1523_vm5, %v2998_v63, 0.0 }
 0x154   : > { %v1240_v3 = vpop.f32.mrb[30].mxu1  ;;  %1564 = vadd.xlane.f32.xlu1 %v1563_v25 }
 0x155   : > { %v1498_v4 = vadd.f32 %v2329_v34, %v1258_v1  ;;  %v1259_v6 = vadd.f32 %v2917_v23, %v1240_v3  ;;  %v1242_v8 = vpop.f32.mrb[31].mxu1 }
 0x157   : > { %v1499_v10 = vadd.f32 %v2330_v38, %v1259_v6  ;;  %v3005_v9 = vadd.f32 %v2924_v32, %v1498_v4 }
 0x159   : > { %v1566_v16 = vsel %vm1523_vm5, %v3005_v9, 0.0  ;;  %v3010_v17 = vadd.f32 %v2924_v32, %v1499_v10 }
 0x15a   : > { %1567 = vadd.xlane.f32.xlu0 %v1566_v16 }
 0x15b   : > { %v1569_v21 = vsel %vm1523_vm5, %v3010_v17, 0.0 }
 0x15c   : > { %1570 = vadd.xlane.f32.xlu1 %v1569_v21 }
 0x1be   : > { %v1532_v18 = vpop.xlane.xlu1 %1531 }
 0x1bf   : > { %v1575_v19 = vmul.f32 0.03125, %v1532_v18  ;;  %v1526_v20 = vpop.xlane.xlu0 %1525 }
 0x1c0   : > { %v1573_v23 = vmul.f32 0.03125, %v1526_v20 }
 0x1c1   : > { %v3015_v24 = vsub.f32 %v2927_v42, %v1575_v19 }
 0x1c2   : > { %v3018_v26 = vsub.f32 %v2930_v45, %v1573_v23  ;;  %v1535_v27 = vpop.xlane.xlu1 %1534 }
 0x1c3   : > { %v1576_v28 = vmul.f32 0.03125, %v1535_v27  ;;  %v1529_v29 = vpop.xlane.xlu0 %1528  ;;  %v1607_v32 = vmul.f32 %v3015_v24, %v3015_v24 }
 0x1c4   : > { %v1574_v30 = vmul.f32 0.03125, %v1529_v29  ;;  %v1605_v12 = vmul.f32 %v3018_v26, %v3018_v26 }
 0x1c5   : > { %v3023_v31 = vsub.f32 %v2935_v49, %v1576_v28  ;;  %v1627_v34 = vsel %vm1523_vm5, %v1607_v32, 0.0 }
 0x1c6   : > { %v3029_v42 = vsub.f32 %v2940_v51, %v1574_v30  ;;  %1628 = vadd.xlane.f32.xlu0 %v1627_v34  ;;  %v1621_v15 = vsel %vm1523_vm5, %v1605_v12, 0.0 }
 0x1c7   : > { %v1538_v45 = vpop.xlane.xlu0 %1537  ;;  %v1608_v36 = vmul.f32 %v3023_v31, %v3023_v31 }
 0x1c8   : > { %v1577_v37 = vmul.f32 0.03125, %v1538_v45  ;;  %v1606_v39 = vmul.f32 %v3029_v42, %v3029_v42 }
 0x1c9   : > { %v1541_v38 = vpop.xlane.xlu1 %1540  ;;  %v1630_v49 = vsel %vm1523_vm5, %v1608_v36, 0.0 }
 0x1ca   : > { %v3038_v40 = vsub.f32 %v2947_v0, %v1577_v37  ;;  %v1578_v41 = vmul.f32 0.03125, %v1541_v38  ;;  %1622 = vadd.xlane.f32.xlu0 %v1621_v15  ;;  %1631 = vadd.xlane.f32.xlu1 %v1630_v49  ;;  %v1624_v48 = vsel %vm1523_vm5, %v1606_v39, 0.0 }
 0x1cb   : > { %v1544_v51 = vpop.xlane.xlu0 %1543 }
 0x1cc   : > { %v3041_v43 = vsub.f32 %v2952_v5, %v1578_v41  ;;  %v1579_v44 = vmul.f32 0.03125, %v1544_v51  ;;  %v1609_v46 = vmul.f32 %v3038_v40, %v3038_v40 }
 0x1cd   : > { %v1547_v47 = vpop.xlane.xlu1 %1546 }
 0x1ce   : > { %v3047_v52 = vsub.f32 %v2955_v7, %v1579_v44  ;;  %v1580_v53 = vmul.f32 0.03125, %v1547_v47  ;;  %1625 = vadd.xlane.f32.xlu1 %v1624_v48  ;;  %v1633_v0 = vsel %vm1523_vm5, %v1609_v46, 0.0  ;;  %v1610_v54 = vmul.f32 %v3041_v43, %v3041_v43 }
 0x1cf   : > { %1634 = vadd.xlane.f32.xlu0 %v1633_v0  ;;  %v1550_v13 = vpop.xlane.xlu0 %1549 }
 0x1d0   : > { %v3053_v5 = vsub.f32 %v2962_v14, %v1580_v53  ;;  %v1636_v55 = vsel %vm1523_vm5, %v1610_v54, 0.0  ;;  %v1611_v56 = vmul.f32 %v3047_v52, %v3047_v52  ;;  %v1581_v58 = vmul.f32 0.03125, %v1550_v13 }
 0x1d1   : > { %v1553_v59 = vpop.xlane.xlu1 %1552 }
 0x1d2   : > { %1637 = vadd.xlane.f32.xlu1 %v1636_v55  ;;  %v1639_v7 = vsel %vm1523_vm5, %v1611_v56, 0.0  ;;  %v1612_v57 = vmul.f32 %v3053_v5, %v3053_v5  ;;  %v3063_v14 = vsub.f32 %v2969_v33, %v1581_v58  ;;  %v1582_v62 = vmul.f32 0.03125, %v1553_v59 }
 0x1d3   : > { %1640 = vadd.xlane.f32.xlu0 %v1639_v7 }
 0x1d4   : > { %v1642_v60 = vsel %vm1523_vm5, %v1612_v57, 0.0  ;;  %v3066_v22 = vsub.f32 %v2974_v35, %v1582_v62  ;;  %v1613_v1 = vmul.f32 %v3063_v14, %v3063_v14 }
 0x1d6   : > { %1643 = vadd.xlane.f32.xlu1 %v1642_v60  ;;  %v1645_v2 = vsel %vm1523_vm5, %v1613_v1, 0.0  ;;  %v1614_v25 = vmul.f32 %v3066_v22, %v3066_v22  ;;  %v3114_v1 = vld [vmem:[%s3312_s9] ss:$0 sm:$0xff] }
 0x1d7   : > { %v1556_v3 = vpop.xlane.xlu0 %1555  ;;  %1646 = vadd.xlane.f32.xlu0 %v1645_v2 }
 0x1d8   : > { %v1583_v4 = vmul.f32 0.03125, %v1556_v3  ;;  %v1648_v6 = vsel %vm1523_vm5, %v1614_v25, 0.0 }
 0x1d9   : > { %v1559_v33 = vpop.xlane.xlu1 %1558 }
 0x1da   : > { %1649 = vadd.xlane.f32.xlu1 %v1648_v6  ;;  %v3075_v8 = vsub.f32 %v2981_v50, %v1583_v4  ;;  %v1584_v35 = vmul.f32 0.03125, %v1559_v33  ;;  %v3120_v6 = vld [vmem:[%s3313_s10] ss:$0 sm:$0xff] }
 0x1dc   : > { %v3078_v10 = vsub.f32 %v2986_v11, %v1584_v35  ;;  %v1615_v16 = vmul.f32 %v3075_v8, %v3075_v8 }
 0x1de   : > { %v1651_v21 = vsel %vm1523_vm5, %v1615_v16, 0.0  ;;  %v1616_v18 = vmul.f32 %v3078_v10, %v3078_v10 }
 0x1df   : > { %1652 = vadd.xlane.f32.xlu0 %v1651_v21  ;;  %v1562_v19 = vpop.xlane.xlu0 %1561 }
 0x1e0   : > { %v1585_v20 = vmul.f32 0.03125, %v1562_v19  ;;  %v1654_v23 = vsel %vm1523_vm5, %v1616_v18, 0.0 }
 0x1e1   : > { %1655 = vadd.xlane.f32.xlu1 %v1654_v23  ;;  %v1565_v50 = vpop.xlane.xlu1 %1564 }
 0x1e2   : > { %v3087_v27 = vsub.f32 %v2993_v61, %v1585_v20  ;;  %v1586_v11 = vmul.f32 0.03125, %v1565_v50 }
 0x1e4   : > { %v3090_v28 = vsub.f32 %v2998_v63, %v1586_v11  ;;  %v1617_v29 = vmul.f32 %v3087_v27, %v3087_v27 }
 0x1e6   : > { %v1657_v32 = vsel %vm1523_vm5, %v1617_v29, 0.0  ;;  %v1618_v30 = vmul.f32 %v3090_v28, %v3090_v28 }
 0x1e7   : > { %1658 = vadd.xlane.f32.xlu0 %v1657_v32  ;;  %v1568_v34 = vpop.xlane.xlu0 %1567 }
 0x1e8   : > { %v1587_v12 = vmul.f32 0.03125, %v1568_v34  ;;  %v1660_v45 = vsel %vm1523_vm5, %v1618_v30, 0.0 }
 0x1e9   : > { %1661 = vadd.xlane.f32.xlu1 %v1660_v45  ;;  %v1571_v61 = vpop.xlane.xlu1 %1570 }
 0x1ea   : > { %v3099_v36 = vsub.f32 %v3005_v9, %v1587_v12  ;;  %v1588_v63 = vmul.f32 0.03125, %v1571_v61 }
 0x1ec   : > { %v3102_v37 = vsub.f32 %v3010_v17, %v1588_v63  ;;  %v1619_v38 = vmul.f32 %v3099_v36, %v3099_v36 }
 0x1ee   : > { %v1663_v15 = vsel %vm1523_vm5, %v1619_v38, 0.0  ;;  %v1620_v49 = vmul.f32 %v3102_v37, %v3102_v37 }
 0x1ef   : > { %1664 = vadd.xlane.f32.xlu0 %v1663_v15 }
 0x1f0   : > { %v1666_v39 = vsel %vm1523_vm5, %v1620_v49, 0.0 }
 0x1f1   : > { %1667 = vadd.xlane.f32.xlu1 %v1666_v39 }
 0x253   : > { %v1629_v41 = vpop.xlane.xlu0 %1628 }
 0x254   : > { %v1671_v51 = vmul.f32 0.03125, %v1629_v41 }
 0x256   : > { %v1687_v9 = vadd.f32 1e-05, %v1671_v51 }
 0x257   : > { %v1623_v44 = vpop.xlane.xlu0 %1622  ;;  %v1632_v46 = vpop.xlane.xlu1 %1631 }
 0x258   : > { %2507 = vrsqrt.f32 %v1687_v9  ;;  %v1669_v17 = vmul.f32 0.03125, %v1623_v44  ;;  %v1672_v47 = vmul.f32 0.03125, %v1632_v46 }
 0x25a   : > { %v1685_v48 = vadd.f32 1e-05, %v1669_v17  ;;  %v1688_v53 = vadd.f32 1e-05, %v1672_v47 }
 0x25b   : > { %v1626_v0 = vpop.xlane.xlu1 %1625 }
 0x25c   : > { %2509 = vrsqrt.f32 %v1685_v48  ;;  %v1670_v54 = vmul.f32 0.03125, %v1626_v0  ;;  %v1635_v55 = vpop.xlane.xlu0 %1634 }
 0x25d   : > { %2511 = vrsqrt.f32 %v1688_v53  ;;  %v1673_v56 = vmul.f32 0.03125, %v1635_v55 }
 0x25e   : > { %v1686_v13 = vadd.f32 1e-05, %v1670_v54 }
 0x25f   : > { %v1689_v7 = vadd.f32 1e-05, %v1673_v56  ;;  %v1638_v57 = vpop.xlane.xlu1 %1637 }
 0x260   : > { %2513 = vrsqrt.f32 %v1686_v13  ;;  %v1674_v58 = vmul.f32 0.03125, %v1638_v57  ;;  %v1641_v59 = vpop.xlane.xlu0 %1640 }
 0x261   : > { %2515 = vrsqrt.f32 %v1689_v7  ;;  %v1675_v60 = vmul.f32 0.03125, %v1641_v59 }
 0x262   : > { %v2508_v62 = vpop.eup %2507  ;;  %v1690_v2 = vadd.f32 1e-05, %v1674_v58 }
 0x263   : > { %v1719_v25 = vmul.f32 %v2508_v62, %v3015_v24  ;;  %v1691_v3 = vadd.f32 1e-05, %v1675_v60  ;;  %v1644_v4 = vpop.xlane.xlu1 %1643 }
 0x264   : > { %2517 = vrsqrt.f32 %v1690_v2  ;;  %v1676_v33 = vmul.f32 0.03125, %v1644_v4  ;;  %v1647_v24 = vpop.xlane.xlu0 %1646 }
 0x265   : > { %v1742_v35 = vmul.f32 %v3114_v1, %v1719_v25  ;;  %2519 = vrsqrt.f32 %v1691_v3  ;;  %v1677_v50 = vmul.f32 0.03125, %v1647_v24 }
 0x266   : > { %v2510_v16 = vpop.eup %2509  ;;  %v1692_v21 = vadd.f32 1e-05, %v1676_v33 }
 0x267   : > { %v2512_v18 = vpop.eup %2511  ;;  %v1765_v19 = vadd.f32 %v3120_v6, %v1742_v35  ;;  %v1717_v20 = vmul.f32 %v2510_v16, %v3018_v26  ;;  %v1650_v29 = vpop.xlane.xlu1 %1649  ;;  %v1693_v34 = vadd.f32 1e-05, %v1677_v50 }
 0x268   : > { %v1720_v23 = vmul.f32 %v2512_v18, %v3023_v31  ;;  %2521 = vrsqrt.f32 %v1692_v21  ;;  %v1678_v26 = vmul.f32 0.03125, %v1650_v29 }
 0x269   : > { %1781 = vst.msk [vmem:[%s3126_s17 + $0x10] sm:$0xff] %vm1523_vm5, %v1765_v19  ;;  %v1740_v11 = vmul.f32 %v3114_v1, %v1717_v20  ;;  %2523 = vrsqrt.f32 %v1693_v34 }
 0x26a   : > { %v2514_v32 = vpop.eup %2513  ;;  %v1743_v30 = vmul.f32 %v3114_v1, %v1720_v23  ;;  %v1694_v38 = vadd.f32 1e-05, %v1678_v26 }
 0x26b   : > { %v2516_v12 = vpop.eup %2515  ;;  %v1763_v31 = vadd.f32 %v3120_v6, %v1740_v11  ;;  %v1718_v45 = vmul.f32 %v2514_v32, %v3029_v42 }
 0x26c   : > { %v1766_v61 = vadd.f32 %v3120_v6, %v1743_v30  ;;  %v1721_v63 = vmul.f32 %v2516_v12, %v3038_v40  ;;  %2525 = vrsqrt.f32 %v1694_v38  ;;  %v1653_v40 = vpop.xlane.xlu0 %1652 }
 0x26d   : > { %1779 = vst.msk [vmem:[%s3126_s17] sm:$0xff] %vm1523_vm5, %v1763_v31  ;;  %v1741_v15 = vmul.f32 %v3114_v1, %v1718_v45  ;;  %v1679_v46 = vmul.f32 0.03125, %v1653_v40 }
 0x26e   : > { %v2518_v49 = vpop.eup %2517  ;;  %1782 = vst.msk [vmem:[%s3126_s17 + $0x18] sm:$0xff] %vm1523_vm5, %v1766_v61  ;;  %v1744_v39 = vmul.f32 %v3114_v1, %v1721_v63  ;;  %v1656_v47 = vpop.xlane.xlu1 %1655 }
 0x26f   : > { %v2520_v41 = vpop.eup %2519  ;;  %v1764_v42 = vadd.f32 %v3120_v6, %v1741_v15  ;;  %v1722_v51 = vmul.f32 %v2518_v49, %v3041_v43  ;;  %v1695_v0 = vadd.f32 1e-05, %v1679_v46  ;;  %v1680_v43 = vmul.f32 0.03125, %v1656_v47 }
 0x270   : > { %v1767_v9 = vadd.f32 %v3120_v6, %v1744_v39  ;;  %v1723_v44 = vmul.f32 %v2520_v41, %v3047_v52 }
 0x271   : > { %1780 = vst.msk [vmem:[%s3126_s17 + $0x8] sm:$0xff] %vm1523_vm5, %v1764_v42  ;;  %v1745_v17 = vmul.f32 %v3114_v1, %v1722_v51  ;;  %2527 = vrsqrt.f32 %v1695_v0  ;;  %v1696_v56 = vadd.f32 1e-05, %v1680_v43 }
 0x272   : > { %v2522_v48 = vpop.eup %2521  ;;  %1783 = vst.msk [vmem:[%s3126_s17 + $0x20] sm:$0xff] %vm1523_vm5, %v1767_v9  ;;  %v1746_v53 = vmul.f32 %v3114_v1, %v1723_v44 }
 0x273   : > { %v1768_v54 = vadd.f32 %v3120_v6, %v1745_v17  ;;  %v1724_v55 = vmul.f32 %v2522_v48, %v3053_v5  ;;  %v2524_v7 = vpop.eup %2523  ;;  %2529 = vrsqrt.f32 %v1696_v56 }
 0x274   : > { %v1769_v52 = vadd.f32 %v3120_v6, %v1746_v53  ;;  %v1725_v58 = vmul.f32 %v2524_v7, %v3063_v14  ;;  %v1659_v59 = vpop.xlane.xlu0 %1658 }
 0x275   : > { %1784 = vst.msk [vmem:[%s3126_s17 + $0x28] sm:$0xff] %vm1523_vm5, %v1768_v54  ;;  %v1747_v13 = vmul.f32 %v3114_v1, %v1724_v55  ;;  %v1681_v5 = vmul.f32 0.03125, %v1659_v59 }
 0x276   : > { %1785 = vst.msk [vmem:[%s3126_s17 + $0x30] sm:$0xff] %vm1523_vm5, %v1769_v52  ;;  %v2526_v60 = vpop.eup %2525  ;;  %v1748_v62 = vmul.f32 %v3114_v1, %v1725_v58  ;;  %v1662_v25 = vpop.xlane.xlu1 %1661 }
 0x277   : > { %v1770_v57 = vadd.f32 %v3120_v6, %v1747_v13  ;;  %v1726_v2 = vmul.f32 %v2526_v60, %v3066_v22  ;;  %v1697_v3 = vadd.f32 1e-05, %v1681_v5  ;;  %v1682_v4 = vmul.f32 0.03125, %v1662_v25 }
 0x278   : > { %v1771_v33 = vadd.f32 %v3120_v6, %v1748_v62 }
 0x279   : > { %1786 = vst.msk [vmem:[%s3126_s17 + $0x38] sm:$0xff] %vm1523_vm5, %v1770_v57  ;;  %v1749_v35 = vmul.f32 %v3114_v1, %v1726_v2  ;;  %2531 = vrsqrt.f32 %v1697_v3  ;;  %v1698_v16 = vadd.f32 1e-05, %v1682_v4 }
 0x27a   : > { %1787 = vst.msk [vmem:[%s3126_s17 + $0x40] sm:$0xff] %vm1523_vm5, %v1771_v33 }
 0x27b   : > { %v1772_v14 = vadd.f32 %v3120_v6, %v1749_v35  ;;  %v2528_v21 = vpop.eup %2527  ;;  %2533 = vrsqrt.f32 %v1698_v16 }
 0x27c   : > { %v1727_v22 = vmul.f32 %v2528_v21, %v3075_v8  ;;  %v1665_v18 = vpop.xlane.xlu0 %1664 }
 0x27d   : > { %1788 = vst.msk [vmem:[%s3126_s17 + $0x48] sm:$0xff] %vm1523_vm5, %v1772_v14  ;;  %v2530_v19 = vpop.eup %2529  ;;  %v1683_v20 = vmul.f32 0.03125, %v1665_v18 }
 0x27e   : > { %v1750_v24 = vmul.f32 %v3114_v1, %v1727_v22  ;;  %v1728_v23 = vmul.f32 %v2530_v19, %v3078_v10  ;;  %v1668_v50 = vpop.xlane.xlu1 %1667 }
 0x27f   : > { %v1699_v11 = vadd.f32 1e-05, %v1683_v20  ;;  %v1684_v29 = vmul.f32 0.03125, %v1668_v50 }
 0x280   : > { %v1773_v32 = vadd.f32 %v3120_v6, %v1750_v24  ;;  %v1751_v30 = vmul.f32 %v3114_v1, %v1728_v23 }
 0x281   : > { %2535 = vrsqrt.f32 %v1699_v11  ;;  %v1700_v34 = vadd.f32 1e-05, %v1684_v29 }
 0x282   : > { %1789 = vst.msk [vmem:[%s3126_s17 + $0x50] sm:$0xff] %vm1523_vm5, %v1773_v32  ;;  %v1774_v8 = vadd.f32 %v3120_v6, %v1751_v30 }
 0x283   : > { %v2532_v26 = vpop.eup %2531  ;;  %2537 = vrsqrt.f32 %v1700_v34 }
 0x284   : > { %1790 = vst.msk [vmem:[%s3126_s17 + $0x58] sm:$0xff] %vm1523_vm5, %v1774_v8  ;;  %v1729_v10 = vmul.f32 %v2532_v26, %v3087_v27 }
 0x285   : > { %v2534_v12 = vpop.eup %2533 }
 0x286   : > { %v1752_v31 = vmul.f32 %v3114_v1, %v1729_v10  ;;  %v1730_v45 = vmul.f32 %v2534_v12, %v3090_v28 }
 0x288   : > { %v1775_v61 = vadd.f32 %v3120_v6, %v1752_v31  ;;  %v1753_v63 = vmul.f32 %v3114_v1, %v1730_v45 }
 0x28a   : > { %1791 = vst.msk [vmem:[%s3126_s17 + $0x60] sm:$0xff] %vm1523_vm5, %v1775_v61  ;;  %v1776_v38 = vadd.f32 %v3120_v6, %v1753_v63 }
 0x28b   : > { %v2536_v15 = vpop.eup %2535 }
 0x28c   : > { %1792 = vst.msk [vmem:[%s3126_s17 + $0x68] sm:$0xff] %vm1523_vm5, %v1776_v38  ;;  %v1731_v27 = vmul.f32 %v2536_v15, %v3099_v36 }
 0x28d   : > { %v2538_v49 = vpop.eup %2537 }
 0x28e   : > { %v1754_v39 = vmul.f32 %v3114_v1, %v1731_v27  ;;  %v1732_v41 = vmul.f32 %v2538_v49, %v3102_v37  ;;  %1801 = sbr.rel (!%p2714_p4) target bundleno = 710 (0x2c6), region = 68 }
 0x290   : > { %v1777_v28 = vadd.f32 %v3120_v6, %v1754_v39  ;;  %v1755_v42 = vmul.f32 %v3114_v1, %v1732_v41 }
 0x292   : > { %1793 = vst.msk [vmem:[%s3126_s17 + $0x70] sm:$0xff] %vm1523_vm5, %v1777_v28  ;;  %v1778_v51 = vadd.f32 %v3120_v6, %v1755_v42 }
 0x294   : > { %1794 = vst.msk [vmem:[%s3126_s17 + $0x78] sm:$0xff] %vm1523_vm5, %v1778_v51 }
 0x295   : > { %s3323_s19 = smov (!%p1804_p8, %s1803_s19), 16 }
 0x296   : > { %s2219_s16 = sshll.u32 %s3323_s19, 7 }
 0x297   : > { %p2222_p9 = scmp.eq.s32.totalorder %s2219_s16, 0 }
 0x298   : > { %s3216_s29 = sshrl.u32 (!%p2222_p9), %s3323_s19, 4 }
 0x299   : > { %1812 = sbr.rel (%p2222_p9) target bundleno = 710 (0x2c6), region = 72  ;;  %p2223_p10 = scmp.le.s32.totalorder (!%p2222_p9), %s3216_s29, 0 }
 0x2a0   : > { %2044 = sbr.rel (%p2223_p10) target bundleno = 689 (0x2b1), region = 157  ;;  %s3316_s20 = smov (!%p2223_p10), %s3210_s28 }
 0x2a1   : > { %s3317_s25 = smov (!%p2223_p10), %s3126_s17  ;;  %s3225_s30 = smov (!%p2223_p10), 0  }
 0x2a2   : > { %s3227_s23 = smov (!%p2223_p10), 0  }
 0x2a7 LB: >> { %v1904_v36 = vld [vmem:[%s2601_s25] sm:$0xff]  ;;  %v1906_v37 = vld [vmem:[%s2601_s25 + $0x8] sm:$0xff]  ;;  %v1908_v1 = vld [vmem:[%s2601_s25 + $0x10] sm:$0xff]  ;;  %s1936_s27 = sadd.s32 1, %s2605_s30  ;;  %s1898_s23 = sadd.s32 1, %s2609_s23   ;;  %s2609_s23 = sphi %s3227_s23, %s1898_s23   ;;  %s2605_s30 = sphi %s3225_s30, %s3318_s30   ;;  %s2601_s25 = sphi %s3317_s25, %s1941_s25   ;;  %s2597_s20 = sphi %s3316_s20, %s1942_s20  }
 0x2a8   : >> { %1905 = vst [vmem:[%s2597_s20] sm:$0xff] %v1904_v36  ;;  %1907 = vst [vmem:[%s2597_s20 + $0x8] sm:$0xff] %v1906_v37  ;;  %v1910_v6 = vld [vmem:[%s2601_s25 + $0x18] sm:$0xff]  ;;  %v1912_v40 = vld [vmem:[%s2601_s25 + $0x20] sm:$0xff]  ;;  %p1937_p11 = scmp.ge.s32.totalorder %s1936_s27, %s3216_s29  ;;  %p1897_p12 = scmp.ge.s32.totalorder %s1898_s23, %s3216_s29 }
 0x2a9   : >> { %1909 = vst [vmem:[%s2597_s20 + $0x10] sm:$0xff] %v1908_v1  ;;  %v1914_v9 = vld [vmem:[%s2601_s25 + $0x28] sm:$0xff]  ;;  %1911 = vst [vmem:[%s2597_s20 + $0x18] sm:$0xff] %v1910_v6  ;;  %v1916_v44 = vld [vmem:[%s2601_s25 + $0x30] sm:$0xff] }
 0x2aa   : >> { %1913 = vst [vmem:[%s2597_s20 + $0x20] sm:$0xff] %v1912_v40  ;;  %1915 = vst [vmem:[%s2597_s20 + $0x28] sm:$0xff] %v1914_v9  ;;  %v1918_v46 = vld [vmem:[%s2601_s25 + $0x38] sm:$0xff]  ;;  %v1920_v17 = vld [vmem:[%s2601_s25 + $0x40] sm:$0xff]  ;;  %s3325_s27 = smov (%p1937_p11, %s1936_s27), 0  ;;  %1900 = sbr.rel (!%p1897_p12) target bundleno = 679 (0x2a7), region = 163 }
 0x2ab   : >> { %1917 = vst [vmem:[%s2597_s20 + $0x30] sm:$0xff] %v1916_v44  ;;  %1919 = vst [vmem:[%s2597_s20 + $0x38] sm:$0xff] %v1918_v46  ;;  %v1922_v47 = vld [vmem:[%s2601_s25 + $0x48] sm:$0xff]  ;;  %v1924_v48 = vld [vmem:[%s2601_s25 + $0x50] sm:$0xff]  ;;  %s2224_s12 = sshll.u32 %s3325_s27, 7  ;;  %s3318_s30 = smov %s3325_s27 }
 0x2ac   : >> { %1921 = vst [vmem:[%s2597_s20 + $0x40] sm:$0xff] %v1920_v17  ;;  %v1926_v53 = vld [vmem:[%s2601_s25 + $0x58] sm:$0xff]  ;;  %1923 = vst [vmem:[%s2597_s20 + $0x48] sm:$0xff] %v1922_v47  ;;  %v1928_v0 = vld [vmem:[%s2601_s25 + $0x60] sm:$0xff] }
 0x2ad   : >> { %1925 = vst [vmem:[%s2597_s20 + $0x50] sm:$0xff] %v1924_v48  ;;  %1927 = vst [vmem:[%s2597_s20 + $0x58] sm:$0xff] %v1926_v53  ;;  %v1930_v43 = vld [vmem:[%s2601_s25 + $0x68] sm:$0xff]  ;;  %v1932_v54 = vld [vmem:[%s2601_s25 + $0x70] sm:$0xff] }
 0x2ae   : >> { %1929 = vst [vmem:[%s2597_s20 + $0x60] sm:$0xff] %v1928_v0  ;;  %1931 = vst [vmem:[%s2597_s20 + $0x68] sm:$0xff] %v1930_v43  ;;  %v1934_v55 = vld [vmem:[%s2601_s25 + $0x78] sm:$0xff]  ;;  %s1941_s25 = scalar_lea.vmem %s3126_s17, %s2224_s12 [#allocation2]  }
 0x2af   : >> { %1933 = vst [vmem:[%s2597_s20 + $0x70] sm:$0xff] %v1932_v54  ;;  %1935 = vst [vmem:[%s2597_s20 + $0x78] sm:$0xff] %v1934_v55  ;;  %s1942_s20 = scalar_lea.vmem %s3210_s28, %s2224_s12  }
 0x2b1 PF: > { %s3285_s13 = sand.u32 15, %s3323_s19   ;;  %s2236_s14 = sshll.u32 %s3216_s29, 7 }
 0x2b2   : > { %s1947_s15 = scalar_lea.vmem %s3126_s17, %s2236_s14 [#allocation2]   ;;  %s1949_s26 = scalar_lea.vmem %s3210_s28, %s2236_s14  }
 0x2b3   : > { %p2229_p13 = scmp.le.s32.totalorder %s3285_s13, 0 }
 0x2b4   : > { %s2611_s22 = smov (!%p2229_p13), %s1949_s26   ;;  %s2615_s16 = smov (!%p2229_p13), %s1947_s15  }
 0x2b5   : > { %2058 = sbr.rel (%p2229_p13) target bundleno = 710 (0x2c6), region = 168  ;;  %s2619_s12 = smov (!%p2229_p13), 0  }
 0x2b6   : > { %s2623_s27 = smov (!%p2229_p13), 0  }
 0x2bc LB: >> { %v1959_v52 = vld [vmem:[%s2617_s16] sm:$0xff]  ;;  %s1961_s19 = sadd.s32 1, %s2621_s12  ;;  %s1953_s27 = sadd.s32 1, %s2625_s27   ;;  %s2625_s27 = sphi %s2623_s27, %s1953_s27   ;;  %s2621_s12 = sphi %s2619_s12, %s2620_s12   ;;  %s2617_s16 = sphi %s2615_s16, %s1966_s16   ;;  %s2613_s22 = sphi %s2611_s22, %s1967_s22  }
 0x2bd   : >> { %1960 = vst [vmem:[%s2613_s22] sm:$0xff] %v1959_v52  ;;  %p1962_p0 = scmp.ge.s32.totalorder %s1961_s19, %s3285_s13  ;;  %p1952_p1 = scmp.ge.s32.totalorder %s1953_s27, %s3285_s13 }
 0x2bf   : >> { %s3327_s19 = smov (%p1962_p0, %s1961_s19), 0  ;;  %1955 = sbr.rel (!%p1952_p1) target bundleno = 700 (0x2bc), region = 174 }
 0x2c0   : >> { %s2230_s17 = sshll.u32 %s3327_s19, 3  ;;  %s2620_s12 = smov %s3327_s19  }
 0x2c1   : >> { %s1966_s16 = scalar_lea.vmem %s1947_s15, %s2230_s17 [#allocation2]   ;;  %s1967_s22 = scalar_lea.vmem %s1949_s26, %s2230_s17  }
 0x2c6 PF: > { %p18_p2 = scmp.ge.s32.totalorder %s2704_s21, 4   ;;  %s3319_s17 = smov %s2589_s18 }
 0x2c7   : > { %s3320_s18 = smov %s2712_s24  ;;  %s3321_s19 = smov %s2704_s21 }
 0x2c8   :  { %20 = sbr.rel (!%p18_p2) target bundleno = 2 (0x2), region = 185 }

</bundles_post_ra>
